<compile_context>
chip_gen: v7x
topology: tpu7x:2x2x1
jax: 0.10.0
libtpu: 0.0.40
codegen_flags: <defaults>
</compile_context>

<pallas_src>
import functools

import jax
import jax.numpy as jnp
from jax import lax
from jax.experimental import pallas as pl
from jax.experimental.pallas import tpu as pltpu


def _dense_layer_kernel(x_ref, scale_ref, shift_ref, w_ref, b_ref, o_ref,
                        slab_ref):
    """One grid step = `nb` images, fully lane-dense.

    x_ref:     (nb, H+2, W*Cin)    H-pre-padded concat input, compute dtype
    scale_ref: (1, W*Cin)          BN fused scale, compute dtype, W-tiled
    shift_ref: (1, W*Cin)          BN fused shift, compute dtype, W-tiled
    w_ref:     (3*W*Cin, W*Cout)   K-stacked Toeplitz conv weight, compute dtype
    b_ref:     (1, W*Cout) f32     conv bias, W-tiled
    o_ref:     (nb, H, W*Cout)     output, compute dtype
    slab_ref:  (nb, H, 3*W*Cin)    VMEM im2col scratch, compute dtype
    """
    nb, hp2, wc = x_ref.shape
    h = hp2 - 2
    wco = o_ref.shape[-1]

    # BatchNorm (fused affine) + ReLU on the VPU in the activation dtype.  The
    # two pre-padded halo rows must stay exact zeros *after* BN+ReLU (the conv's
    # zero padding sits after the nonlinearity), so mask them back to zero.
    x = x_ref[...]
    x = jnp.maximum(x * scale_ref[0] + shift_ref[0], 0.0)
    row = lax.broadcasted_iota(jnp.int32, (1, hp2, 1), 1)
    x = jnp.where((row >= 1) & (row <= h), x, 0.0)

    # im2col slab: the three H-shifted views side by side on the lane axis.
    # This slab write is the only in-kernel activation copy.
    for dh in range(3):
        slab_ref[:, :, dh * wc:(dh + 1) * wc] = x[:, dh:dh + h, :]

    # One K = 3*W*Cin MXU matmul (f32 accumulation) instead of three K = W*Cin
    # dots -> better MXU fill and a single result-FIFO/MRB drain.
    lhs = slab_ref[...].reshape(nb * h, 3 * wc)
    acc = jnp.dot(lhs, w_ref[...], preferred_element_type=jnp.float32)
    acc = acc + b_ref[0]
    o_ref[...] = acc.reshape(nb, h, wco).astype(o_ref.dtype)


def _toeplitz_conv_weight(conv_w_oihw, W, compute_dtype):
    """Expand an OIHW 3x3 weight into a K-stacked Toeplitz matrix
    (3*W*Cin, W*Cout):

      R[dh*W*Cin + w_in*Cin + ci, w_out*Cout + co]
          = w[co, ci, dh, w_in - w_out + 1]   if |w_in - w_out| <= 1 else 0

    The zero entries implement the conv's zero padding along W; the H padding
    is handled by the wrapper pre-pad + the kernel's halo mask.
    """
    w_hwio = jnp.transpose(conv_w_oihw, (2, 3, 1, 0))            # (3, 3, Cin, Cout)
    _, _, Cin, Cout = w_hwio.shape
    dw = jnp.arange(W)[:, None] - jnp.arange(W)[None, :] + 1     # (W_in, W_out)
    valid = (dw >= 0) & (dw <= 2)
    g = w_hwio[:, jnp.clip(dw, 0, 2), :, :]                      # (3, W_in, W_out, Cin, Cout)
    g = jnp.where(valid[None, :, :, None, None], g, 0.0)
    R = jnp.transpose(g, (0, 1, 3, 2, 4)).reshape(3 * W * Cin, W * Cout)
    return R.astype(compute_dtype)


@functools.lru_cache(maxsize=None)
def _tpu_layout():
    """(per-core VMEM bytes, TensorCores per chip), with conservative fallbacks."""
    vmem = 128 * 1024 * 1024
    cores = 1
    try:
        info = pltpu.get_tpu_info()
        vmem = int(getattr(info, "vmem_capacity_bytes", vmem))
    except Exception:
        pass
    try:
        cores = max(1, int(getattr(jax.devices()[0], "num_cores", 1)))
    except Exception:
        pass
    if vmem <= 64 * 1024 * 1024:
        cores = max(cores, 2)          # v7x: 64 MiB per TC, 2 TCs share the chip
    return vmem, cores


def _largest_divisor_at_most(n, cap):
    cap = max(1, min(int(cap), n))
    for d in range(cap, 0, -1):
        if n % d == 0:
            return d
    return 1


def _invariant_spec(block_shape, index_map):
    """Grid-invariant operand: single-buffer it so it doesn't reserve 2x VMEM."""
    if hasattr(pl, "Buffered"):
        try:
            return pl.BlockSpec(block_shape, index_map,
                                pipeline_mode=pl.Buffered(1))
        except Exception:
            pass
    return pl.BlockSpec(block_shape, index_map)


@functools.partial(jax.jit,
                   static_argnames=("eps", "compute_dtype", "images_per_block"))
def dense_layer_forward(inputs_nchw, gamma, beta, running_mean, running_var,
                        conv_w_oihw, conv_b, eps=1e-5,
                        compute_dtype=jnp.bfloat16, images_per_block=None):
    """inputs_nchw: tuple of NCHW tensors (the dense-block feature list).

    Returns the DenseLayer output in NCHW, in `compute_dtype` (the next dense
    layer concatenates and re-casts anyway; cast up only if a consumer needs f32).
    """
    # TODO(synk): keep features NHWC across the whole dense block to drop these
    # two transposes (each is a full HBM pass at mem-bound shapes).
    x = jnp.concatenate(inputs_nchw, axis=1)                     # (N, Cin, H, W)
    x = jnp.transpose(x, (0, 2, 3, 1))                           # NHWC
    N, H, W, Cin = x.shape
    Cout = conv_w_oihw.shape[0]
    itemsize = jnp.dtype(compute_dtype).itemsize

    # Fold eval-mode BN into a per-channel scale/shift in the compute dtype
    # (bf16 BN+ReLU on bf16-VPU chips); tile over W so the elementwise stage and
    # the slab stores are lane-dense.
    scale = (gamma / jnp.sqrt(running_var + eps)).astype(jnp.float32)
    shift = beta.astype(jnp.float32) - running_mean.astype(jnp.float32) * scale
    scale_t = jnp.tile(scale, W).reshape(1, W * Cin).astype(compute_dtype)
    shift_t = jnp.tile(shift, W).reshape(1, W * Cin).astype(compute_dtype)
    bias_t = jnp.tile(conv_b.astype(jnp.float32), W).reshape(1, W * Cout)

    # K-stacked Toeplitz conv weight: one (3*W*Cin, W*Cout) MXU operand.
    w_fused = _toeplitz_conv_weight(conv_w_oihw, W, compute_dtype)

    # Lane-dense activation view, H pre-padded once here (removes the in-kernel
    # pad copy; the 2/H extra HBM traffic is hidden by the pipeline).
    x_lane = jnp.pad(x.reshape(N, H, W * Cin).astype(compute_dtype),
                     ((0, 0), (1, 1), (0, 0)))                   # (N, H+2, W*Cin)

    # --- per-generation block-size / VMEM heuristics --------------------------
    vmem_phys, num_tc = _tpu_layout()
    vmem_cap = int(vmem_phys * 0.82)       # headroom for compiler internal scratch

    in_img = (H + 2) * W * Cin * itemsize
    out_img = H * W * Cout * itemsize
    slab_img = 3 * H * W * Cin * itemsize
    # double-buffered in/out blocks + im2col slab + one in-flight activation temp
    per_img = 2 * (in_img + out_img) + slab_img + in_img
    inv_buf = 1 if hasattr(pl, "Buffered") else 2
    invariant_bytes = inv_buf * ((3 * W * Cin * W * Cout + 2 * W * Cin) * itemsize
                                 + W * Cout * 4)
    headroom = 4 << 20
    budget = max(vmem_cap - invariant_bytes - headroom, per_img)

    if images_per_block is None:
        nb = _largest_divisor_at_most(N, budget // per_img)
        if num_tc > 1:
            # v7x: keep >= ~3 grid steps per TensorCore (when N allows) so both
            # cores get work and prefetch / writeback stay overlapped.
            want_steps = min(N, 3 * num_tc)
            while nb > 1 and (N // nb) < want_steps:
                nb = _largest_divisor_at_most(N, nb - 1)
    else:
        # Round a user value down to a divisor of N that also fits the budget.
        nb = _largest_divisor_at_most(N, images_per_block)
        nb = min(nb, _largest_divisor_at_most(N, budget // per_img))
    assert N % nb == 0, (N, nb)
    grid = (N // nb,)

    est = (2 * nb * (in_img + out_img) + nb * slab_img + nb * in_img
           + invariant_bytes + headroom)
    vmem_limit = int(min(vmem_cap, max(est, 32 << 20)))

    out = pl.pallas_call(
        _dense_layer_kernel,
        out_shape=jax.ShapeDtypeStruct((N, H, W * Cout), compute_dtype),
        grid_spec=pltpu.PrefetchScalarGridSpec(
            num_scalar_prefetch=0,
            grid=grid,
            in_specs=[
                pl.BlockSpec((nb, H + 2, W * Cin), lambda i: (i, 0, 0)),
                _invariant_spec((1, W * Cin), lambda i: (0, 0)),
                _invariant_spec((1, W * Cin), lambda i: (0, 0)),
                _invariant_spec((3 * W * Cin, W * Cout), lambda i: (0, 0)),
                _invariant_spec((1, W * Cout), lambda i: (0, 0)),
            ],
            out_specs=pl.BlockSpec((nb, H, W * Cout), lambda i: (i, 0, 0)),
            scratch_shapes=[pltpu.VMEM((nb, H, 3 * W * Cin), compute_dtype)],
        ),
        compiler_params=pltpu.CompilerParams(
            dimension_semantics=("parallel",),
            vmem_limit_bytes=vmem_limit),
    )(x_lane, scale_t, shift_t, w_fused, bias_t)

    # Dropout(p=0.2) in eval mode is identity.
    out = out.reshape(N, H, W, Cout)
    return jnp.transpose(out, (0, 3, 1, 2))                      # back to NCHW


def _reference_forward(inputs_nchw, gamma, beta, running_mean, running_var,
                       conv_w_oihw, conv_b, eps=1e-5, compute_dtype=jnp.float32):
    """Pure-JAX reference (eval BN + ReLU + 3x3 conv + bias) that applies the
    same compute-dtype rounding as the kernel (BN and conv operands in
    compute_dtype, f32 accumulation, f32 bias)."""
    x = jnp.concatenate(inputs_nchw, axis=1).astype(compute_dtype)
    scale = (gamma / jnp.sqrt(running_var + eps)).astype(jnp.float32)
    shift = beta.astype(jnp.float32) - running_mean.astype(jnp.float32) * scale
    scale = scale.astype(compute_dtype)
    shift = shift.astype(compute_dtype)
    x = x * scale[None, :, None, None] + shift[None, :, None, None]
    x = jnp.maximum(x, 0.0)
    y = lax.conv_general_dilated(
        x, conv_w_oihw.astype(compute_dtype),
        window_strides=(1, 1), padding=((1, 1), (1, 1)),
        dimension_numbers=("NCHW", "OIHW", "NCHW"),
        preferred_element_type=jnp.float32)
    return y + conv_b.astype(jnp.float32)[None, :, None, None]


if __name__ == "__main__":
    key = jax.random.PRNGKey(0)
    k0, k1, k2, k3, k4, k5, k6 = jax.random.split(key, 7)

    # Shapes consistent with the module: two feature maps of 4 channels each
    # -> in_channels = 8; growth_rate = 8.
    N, H, W = 2, 16, 16
    c0, c1 = 4, 4
    in_channels = c0 + c1
    growth_rate = 8

    x0 = jax.random.normal(k0, (N, c0, H, W), dtype=jnp.float32)
    x1 = jax.random.normal(k1, (N, c1, H, W), dtype=jnp.float32)

    # BatchNorm2d(in_channels) parameters + running stats (deterministic).
    gamma = 1.0 + 0.1 * jax.random.normal(k2, (in_channels,), dtype=jnp.float32)
    beta = 0.1 * jax.random.normal(k3, (in_channels,), dtype=jnp.float32)
    running_mean = 0.05 * jax.random.normal(k4, (in_channels,), dtype=jnp.float32)
    running_var = 1.0 + 0.1 * jnp.abs(
        jax.random.normal(k5, (in_channels,), dtype=jnp.float32))

    # Conv2d(in_channels, growth_rate, 3, padding=1, bias=True) parameters (OIHW).
    conv_w = 0.1 * jax.random.normal(
        k6, (growth_rate, in_channels, 3, 3), dtype=jnp.float32)
    conv_b = 0.01 * jnp.arange(growth_rate, dtype=jnp.float32)

    args = ((x0, x1), gamma, beta, running_mean, running_var, conv_w, conv_b)

    # --- fast path: bf16 BN / MXU operands / output, f32 accumulation ---
    out_bf16 = jax.block_until_ready(dense_layer_forward(*args))
    assert out_bf16.shape == (N, growth_rate, H, W), out_bf16.shape
    assert out_bf16.dtype == jnp.bfloat16, out_bf16.dtype
    out_bf16_f32 = out_bf16.astype(jnp.float32)

    ref_f32 = _reference_forward(*args, compute_dtype=jnp.float32)
    ref_bf16 = _reference_forward(*args, compute_dtype=jnp.bfloat16)

    # vs bf16-rounded reference: differences = f32 accumulation order + the
    # final bf16 rounding of the kernel output.
    err_bf16 = float(jnp.max(jnp.abs(out_bf16_f32 - ref_bf16)))
    assert jnp.allclose(out_bf16_f32, ref_bf16, atol=3e-2, rtol=3e-2), err_bf16
    # vs the full-precision reference: bounded by bf16 operand rounding.
    err_vs_f32 = float(jnp.max(jnp.abs(out_bf16_f32 - ref_f32)))
    assert jnp.allclose(out_bf16_f32, ref_f32, atol=5e-2, rtol=5e-2), err_vs_f32

    # --- full-precision path: must match the f32 reference tightly ---
    out_f32 = jax.block_until_ready(
        dense_layer_forward(*args, compute_dtype=jnp.float32))
    assert out_f32.dtype == jnp.float32, out_f32.dtype
    err_f32 = float(jnp.max(jnp.abs(out_f32 - ref_f32)))
    assert jnp.allclose(out_f32, ref_f32, atol=2e-4, rtol=2e-4), err_f32

    print("KERNEL_OK")
</pallas_src>

<mosaic_0001>
module attributes {stable_mosaic.version = 11 : i64} {
  func.func @_dense_layer_kernel(%arg0: i32, %arg1: memref<2x18x128xbf16, #tpu.memory_space<vmem>>, %arg2: memref<1x128xbf16, #tpu.memory_space<vmem>>, %arg3: memref<1x128xbf16, #tpu.memory_space<vmem>>, %arg4: memref<384x128xbf16, #tpu.memory_space<vmem>>, %arg5: memref<1x128xf32, #tpu.memory_space<vmem>>, %arg6: memref<2x16x128xbf16, #tpu.memory_space<vmem>>, %arg7: memref<2x16x384xbf16, #tpu.memory_space<vmem>>) attributes {dimension_semantics = [#tpu.dimension_semantics<parallel>], iteration_bounds = array<i64: 1>, scalar_prefetch = 0 : i64, scratch_operands = 1 : i64, tpu.core_type = #tpu.core_type<tc>, window_params = [{transform_indices = @transform_0, window_bounds = array<i64: 2, 18, 128>}, {pipeline_mode = #tpu.pipeline_mode<synchronous>, transform_indices = @transform_1, window_bounds = array<i64: 1, 128>}, {pipeline_mode = #tpu.pipeline_mode<synchronous>, transform_indices = @transform_2, window_bounds = array<i64: 1, 128>}, {pipeline_mode = #tpu.pipeline_mode<synchronous>, transform_indices = @transform_3, window_bounds = array<i64: 384, 128>}, {pipeline_mode = #tpu.pipeline_mode<synchronous>, transform_indices = @transform_4, window_bounds = array<i64: 1, 128>}, {transform_indices = @transform_5, window_bounds = array<i64: 2, 16, 128>}]} {
    %c0 = arith.constant 0 : index
    %c0_0 = arith.constant 0 : index
    %c0_1 = arith.constant 0 : index
    %0 = vector.load %arg1[%c0, %c0_0, %c0_1] : memref<2x18x128xbf16, #tpu.memory_space<vmem>>, vector<2x18x128xbf16>
    %c0_2 = arith.constant 0 : index
    %c0_3 = arith.constant 0 : index
    %1 = vector.load %arg2[%c0_2, %c0_3] : memref<1x128xbf16, #tpu.memory_space<vmem>>, vector<1x128xbf16>
    %2 = vector.shape_cast %1 : vector<1x128xbf16> to vector<128xbf16>
    %3 = vector.shape_cast %2 : vector<128xbf16> to vector<1x1x128xbf16>
    %4 = vector.broadcast %3 : vector<1x1x128xbf16> to vector<2x18x128xbf16>
    %5 = arith.mulf %0, %4 : vector<2x18x128xbf16>
    %c0_4 = arith.constant 0 : index
    %c0_5 = arith.constant 0 : index
    %6 = vector.load %arg3[%c0_4, %c0_5] : memref<1x128xbf16, #tpu.memory_space<vmem>>, vector<1x128xbf16>
    %7 = vector.shape_cast %6 : vector<1x128xbf16> to vector<128xbf16>
    %8 = vector.shape_cast %7 : vector<128xbf16> to vector<1x1x128xbf16>
    %9 = vector.broadcast %8 : vector<1x1x128xbf16> to vector<2x18x128xbf16>
    %10 = arith.addf %5, %9 : vector<2x18x128xbf16>
    %cst = arith.constant 0.000000e+00 : bf16
    %11 = vector.broadcast %cst : bf16 to vector<2x18x128xbf16>
    %12 = arith.maximumf %10, %11 : vector<2x18x128xbf16>
    %13 = tpu.iota {dimensions = array<i32: 1>} : vector<1x18x1xi32>
    %c1_i32 = arith.constant 1 : i32
    %14 = vector.broadcast %c1_i32 : i32 to vector<1x18x1xi32>
    %15 = arith.cmpi sge, %13, %14 : vector<1x18x1xi32>
    %c16_i32 = arith.constant 16 : i32
    %16 = vector.broadcast %c16_i32 : i32 to vector<1x18x1xi32>
    %17 = arith.cmpi sle, %13, %16 : vector<1x18x1xi32>
    %18 = arith.andi %15, %17 : vector<1x18x1xi1>
    %cst_6 = arith.constant 0.000000e+00 : f32
    %19 = arith.truncf %cst_6 : f32 to bf16
    %20 = vector.shape_cast %18 : vector<1x18x1xi1> to vector<1x18x1xi1>
    %21 = vector.broadcast %20 : vector<1x18x1xi1> to vector<2x18x128xi1>
    %22 = vector.broadcast %19 : bf16 to vector<2x18x128xbf16>
    %23 = arith.select %21, %12, %22 : vector<2x18x128xi1>, vector<2x18x128xbf16>
    %24 = vector.extract_strided_slice %23 {offsets = [0, 0, 0], sizes = [2, 16, 128], strides = [1, 1, 1]} : vector<2x18x128xbf16> to vector<2x16x128xbf16>
    %c0_7 = arith.constant 0 : index
    %c0_8 = arith.constant 0 : index
    %c0_9 = arith.constant 0 : index
    %25 = vector.load %arg7[%c0_7, %c0_8, %c0_9] : memref<2x16x384xbf16, #tpu.memory_space<vmem>>, vector<2x16x128xbf16>
    tpu.vector_store %arg7[%c0_7, %c0_8, %c0_9], %24 {strides = array<i32>} : memref<2x16x384xbf16, #tpu.memory_space<vmem>>, vector<2x16x128xbf16>,
    %26 = vector.extract_strided_slice %23 {offsets = [0, 1, 0], sizes = [2, 16, 128], strides = [1, 1, 1]} : vector<2x18x128xbf16> to vector<2x16x128xbf16>
    %c0_10 = arith.constant 0 : index
    %c0_11 = arith.constant 0 : index
    %c128 = arith.constant 128 : index
    %27 = vector.load %arg7[%c0_10, %c0_11, %c128] : memref<2x16x384xbf16, #tpu.memory_space<vmem>>, vector<2x16x128xbf16>
    tpu.vector_store %arg7[%c0_10, %c0_11, %c128], %26 {strides = array<i32>} : memref<2x16x384xbf16, #tpu.memory_space<vmem>>, vector<2x16x128xbf16>,
    %28 = vector.extract_strided_slice %23 {offsets = [0, 2, 0], sizes = [2, 16, 128], strides = [1, 1, 1]} : vector<2x18x128xbf16> to vector<2x16x128xbf16>
    %c0_12 = arith.constant 0 : index
    %c0_13 = arith.constant 0 : index
    %c256 = arith.constant 256 : index
    %29 = vector.load %arg7[%c0_12, %c0_13, %c256] : memref<2x16x384xbf16, #tpu.memory_space<vmem>>, vector<2x16x128xbf16>
    tpu.vector_store %arg7[%c0_12, %c0_13, %c256], %28 {strides = array<i32>} : memref<2x16x384xbf16, #tpu.memory_space<vmem>>, vector<2x16x128xbf16>,
    %c0_14 = arith.constant 0 : index
    %c0_15 = arith.constant 0 : index
    %c0_16 = arith.constant 0 : index
    %30 = vector.load %arg7[%c0_14, %c0_15, %c0_16] : memref<2x16x384xbf16, #tpu.memory_space<vmem>>, vector<2x16x384xbf16>
    %31 = vector.shape_cast %30 : vector<2x16x384xbf16> to vector<32x384xbf16>
    %c0_17 = arith.constant 0 : index
    %c0_18 = arith.constant 0 : index
    %32 = vector.load %arg4[%c0_17, %c0_18] : memref<384x128xbf16, #tpu.memory_space<vmem>>, vector<384x128xbf16>
    %cst_19 = arith.constant dense<0.000000e+00> : vector<32x128xf32>
    %33 = tpu.matmul %31, %32, %cst_19 {dimension_numbers = #tpu.dot_dimension_numbers<[1], [0], [0], [1], [0, 0, 1, 1], [], []>} : vector<32x384xbf16>, vector<384x128xbf16>, vector<32x128xf32> -> vector<32x128xf32>
    %c0_20 = arith.constant 0 : index
    %c0_21 = arith.constant 0 : index
    %34 = vector.load %arg5[%c0_20, %c0_21] : memref<1x128xf32, #tpu.memory_space<vmem>>, vector<1x128xf32>
    %35 = vector.shape_cast %34 : vector<1x128xf32> to vector<128xf32>
    %36 = vector.shape_cast %35 : vector<128xf32> to vector<1x128xf32>
    %37 = vector.broadcast %36 : vector<1x128xf32> to vector<32x128xf32>
    %38 = arith.addf %33, %37 : vector<32x128xf32>
    %39 = vector.shape_cast %38 : vector<32x128xf32> to vector<2x16x128xf32>
    %40 = arith.truncf %39 : vector<2x16x128xf32> to vector<2x16x128xbf16>
    %c0_22 = arith.constant 0 : index
    %c0_23 = arith.constant 0 : index
    %c0_24 = arith.constant 0 : index
    %41 = vector.load %arg6[%c0_22, %c0_23, %c0_24] : memref<2x16x128xbf16, #tpu.memory_space<vmem>>, vector<2x16x128xbf16>
    tpu.vector_store %arg6[%c0_22, %c0_23, %c0_24], %40 {strides = array<i32>} : memref<2x16x128xbf16, #tpu.memory_space<vmem>>, vector<2x16x128xbf16>,
    return
  }
  func.func @transform_0(%arg0: i32) -> (i32, i32, i32) {
    %c0_i32 = arith.constant 0 : i32
    %c0_i32_0 = arith.constant 0 : i32
    %c0_i32_1 = arith.constant 0 : i32
    return %arg0, %c0_i32, %c0_i32_0 : i32, i32, i32
  }
  func.func @transform_1(%arg0: i32) -> (i32, i32) {
    %c0_i32 = arith.constant 0 : i32
    %c0_i32_0 = arith.constant 0 : i32
    %c0_i32_1 = arith.constant 0 : i32
    return %c0_i32, %c0_i32_0 : i32, i32
  }
  func.func @transform_2(%arg0: i32) -> (i32, i32) {
    %c0_i32 = arith.constant 0 : i32
    %c0_i32_0 = arith.constant 0 : i32
    %c0_i32_1 = arith.constant 0 : i32
    return %c0_i32, %c0_i32_0 : i32, i32
  }
  func.func @transform_3(%arg0: i32) -> (i32, i32) {
    %c0_i32 = arith.constant 0 : i32
    %c0_i32_0 = arith.constant 0 : i32
    %c0_i32_1 = arith.constant 0 : i32
    return %c0_i32, %c0_i32_0 : i32, i32
  }
  func.func @transform_4(%arg0: i32) -> (i32, i32) {
    %c0_i32 = arith.constant 0 : i32
    %c0_i32_0 = arith.constant 0 : i32
    %c0_i32_1 = arith.constant 0 : i32
    return %c0_i32, %c0_i32_0 : i32, i32
  }
  func.func @transform_5(%arg0: i32) -> (i32, i32, i32) {
    %c0_i32 = arith.constant 0 : i32
    %c0_i32_0 = arith.constant 0 : i32
    %c0_i32_1 = arith.constant 0 : i32
    return %arg0, %c0_i32, %c0_i32_0 : i32, i32, i32
  }
}

</mosaic_0001>

<bundles_post_ra>
// kernel: tile.28
= control target key start
LH: loop header
LB: loop body
LE: loop exit
PB: predicated region body
PF: predicated region fallthrough
CT: control target
= control target key end

     0   :  { %s28_s0 = inlined_call_operand.vmem [shape: f32[8], index: 0, kind: input, shape index: {}]   ;;  %s29_s1 = inlined_call_operand.vmem [shape: f32[16,8], index: 1, kind: output, shape index: {}]  }
   0x1   :  { %v4_v0 = vld [vmem:[%s28_s0] ss:$0 sm:$0xff] }
   0x2   :  { %5 = vst [vmem:[%s29_s1] sm:$0xff] %v4_v0  ;;  %8 = vst [vmem:[%s29_s1 + $0x8] sm:$0xff] %v4_v0 }

// kernel: tile.29
= control target key start
LH: loop header
LB: loop body
LE: loop exit
PB: predicated region body
PF: predicated region fallthrough
CT: control target
= control target key end

     0   :  { %s131_s10 = smov 120   ;;  %s132_s11 = smov 104   ;;  %vm3_vm0 = vcmask 64512   ;;  %vm9_vm1 = vcmask 1048512   ;;  %vm15_vm2 = vcmask 982912   ;;  %vm21_vm3 = vcmask 917312   ;;  %s207_s0 = inlined_call_operand.vmem [shape: f32[16,8], index: 0, kind: input, shape index: {}]   ;;  %s208_s1 = inlined_call_operand.vmem [shape: f32[1,128], index: 1, kind: output, shape index: {}]  }
   0x1   :  { %v101_v0 = vld [vmem:[%s207_s0 + $0xf] sm:$0x1]   ;;  %v103_v1 = vld [vmem:[%s207_s0 + $0xd] sm:$0x1]   ;;  %v102_v2 = vld [vmem:[%s207_s0 + $0xe] sm:$0x1]  }
   0x2   :  { %7 = vrot.lane.b32.xlu0 %v101_v0, %s131_s10  ;;  %19 = vrot.lane.b32.xlu1 %v103_v1, %s132_s11  ;;  %v104_v3 = vld [vmem:[%s207_s0 + $0xc] sm:$0x1]   ;;  %s133_s16 = smov 112   ;;  %s134_s17 = smov 96   ;;  %v105_v4 = vld [vmem:[%s207_s0 + $0xb] sm:$0x1]  }
   0x3   :  { %v106_v5 = vld [vmem:[%s207_s0 + $0xa] sm:$0x1]   ;;  %v2_v6 = vld [vmem:[%s207_s0] sm:$0x1]   ;;  %s135_s24 = smov 88   ;;  %s136_s25 = smov 80  }
   0x4   :  { %4 = vst.msk [vmem:[#allocation0] sm:$0x1] %vm3_vm0, %v2_v6   ;;  %v107_v7 = vld [vmem:[%s207_s0 + $0x9] sm:$0x1]   ;;  %v108_v8 = vld [vmem:[%s207_s0 + $0x8] sm:$0x1]  }
   0x5   :  { %s137_s30 = smov 72   ;;  %s138_s2 = smov 64   ;;  %v109_v9 = vld [vmem:[%s207_s0 + $0x7] sm:$0x1]   ;;  %v110_v10 = vld [vmem:[%s207_s0 + $0x6] sm:$0x1]  }
   0x6   :  { %13 = vrot.lane.b32.xlu0 %v102_v2, %s133_s16  ;;  %25 = vrot.lane.b32.xlu1 %v104_v3, %s134_s17  ;;  %s139_s7 = smov 56   ;;  %s140_s8 = smov 48   ;;  %v111_v11 = vld [vmem:[%s207_s0 + $0x5] sm:$0x1]   ;;  %v112_v12 = vld [vmem:[%s207_s0 + $0x4] sm:$0x1]  }
   0x7   :  { %s141_s13 = smov 40   ;;  %s142_s14 = smov 32   ;;  %v113_v13 = vld [vmem:[%s207_s0 + $0x3] sm:$0x1]   ;;  %v114_v14 = vld [vmem:[%s207_s0 + $0x2] sm:$0x1]  }
   0x8   :  { %s143_s19 = smov 24   ;;  %s144_s20 = smov 16   ;;  %v115_v15 = vld [vmem:[%s207_s0 + $0x1] sm:$0x1]   ;;  %vm27_vm4 = vcmask 851712   ;;  %vm33_vm5 = vcmask 786112  }
   0x9   :  { %s145_s0 = smov 8   ;;  %vm39_vm6 = vcmask 720512   ;;  %vm45_vm7 = vcmask 654912   ;;  %vm51_vm8 = vcmask 589312   ;;  %vm57_vm9 = vcmask 523712  }
   0xa   :  { %31 = vrot.lane.b32.xlu0 %v105_v4, %s135_s24  ;;  %37 = vrot.lane.b32.xlu1 %v106_v5, %s136_s25  ;;  %vm63_vm10 = vcmask 458112   ;;  %vm69_vm11 = vcmask 392512   ;;  %vm75_vm12 = vcmask 326912   ;;  %vm81_vm13 = vcmask 261312  }
   0xb   :  { %vm87_vm14 = vcmask 195712   ;;  %vm93_vm15 = vcmask 130112  }
   0xe   :  { %43 = vrot.lane.b32.xlu0 %v107_v7, %s137_s30  ;;  %49 = vrot.lane.b32.xlu1 %v108_v8, %s138_s2 }
  0x12   :  { %55 = vrot.lane.b32.xlu0 %v109_v9, %s139_s7  ;;  %61 = vrot.lane.b32.xlu1 %v110_v10, %s140_s8 }
  0x16   :  { %67 = vrot.lane.b32.xlu0 %v111_v11, %s141_s13  ;;  %73 = vrot.lane.b32.xlu1 %v112_v12, %s142_s14 }
  0x1a   :  { %79 = vrot.lane.b32.xlu0 %v113_v13, %s143_s19  ;;  %85 = vrot.lane.b32.xlu1 %v114_v14, %s144_s20 }
  0x1e   :  { %91 = vrot.lane.b32.xlu0 %v115_v15, %s145_s0 }
  0x74   :  { %v8_v16 = vpop.permute.xlu0 %7   ;;  %v20_v17 = vpop.permute.xlu1 %19  }
  0x75   :  { %10 = vst.msk [vmem:[#allocation0] sm:$0x1] %vm9_vm1, %v8_v16  }
  0x78   :  { %v14_v18 = vpop.permute.xlu0 %13   ;;  %v26_v19 = vpop.permute.xlu1 %25  }
  0x79   :  { %16 = vst.msk [vmem:[#allocation0] sm:$0x1] %vm15_vm2, %v14_v18  }
  0x7a   :  { %22 = vst.msk [vmem:[#allocation0] sm:$0x1] %vm21_vm3, %v20_v17  }
  0x7b   :  { %28 = vst.msk [vmem:[#allocation0] sm:$0x1] %vm27_vm4, %v26_v19  }
  0x7c   :  { %v32_v20 = vpop.permute.xlu0 %31   ;;  %v38_v21 = vpop.permute.xlu1 %37  }
  0x7d   :  { %34 = vst.msk [vmem:[#allocation0] sm:$0x1] %vm33_vm5, %v32_v20  }
  0x7e   :  { %40 = vst.msk [vmem:[#allocation0] sm:$0x1] %vm39_vm6, %v38_v21  }
  0x80   :  { %v44_v22 = vpop.permute.xlu0 %43   ;;  %v50_v23 = vpop.permute.xlu1 %49  }
  0x81   :  { %46 = vst.msk [vmem:[#allocation0] sm:$0x1] %vm45_vm7, %v44_v22  }
  0x82   :  { %52 = vst.msk [vmem:[#allocation0] sm:$0x1] %vm51_vm8, %v50_v23  }
  0x84   :  { %v56_v24 = vpop.permute.xlu0 %55   ;;  %v62_v25 = vpop.permute.xlu1 %61  }
  0x85   :  { %58 = vst.msk [vmem:[#allocation0] sm:$0x1] %vm57_vm9, %v56_v24  }
  0x86   :  { %64 = vst.msk [vmem:[#allocation0] sm:$0x1] %vm63_vm10, %v62_v25  }
  0x88   :  { %v68_v26 = vpop.permute.xlu0 %67   ;;  %v74_v27 = vpop.permute.xlu1 %73  }
  0x89   :  { %70 = vst.msk [vmem:[#allocation0] sm:$0x1] %vm69_vm11, %v68_v26  }
  0x8a   :  { %76 = vst.msk [vmem:[#allocation0] sm:$0x1] %vm75_vm12, %v74_v27  }
  0x8c   :  { %v80_v28 = vpop.permute.xlu0 %79   ;;  %v86_v29 = vpop.permute.xlu1 %85  }
  0x8d   :  { %82 = vst.msk [vmem:[#allocation0] sm:$0x1] %vm81_vm13, %v80_v28  }
  0x8e   :  { %88 = vst.msk [vmem:[#allocation0] sm:$0x1] %vm87_vm14, %v86_v29  }
  0x90   :  { %v92_v30 = vpop.permute.xlu0 %91  }
  0x91   :  { %94 = vst.msk [vmem:[#allocation0] sm:$0x1] %vm93_vm15, %v92_v30  }
  0x98   :  { %v98_v31 = vld [vmem:[#allocation0] sm:$0x1] }
  0x99   :  { %100 = vst [vmem:[%s208_s1] sm:$0x1] %v98_v31 }

// kernel: dense_layer_forward.1
= control target key start
LH: loop header
LB: loop body
LE: loop exit
PB: predicated region body
PF: predicated region fallthrough
CT: control target
= control target key end

     0   :  { %v31_v15 = vlaneseq  ;;  %vm618_vm3 = vmmov 1   ;;  %v619_v57 = vmov 0   ;;  %vm146_vm6 = vcmask 1046528   ;;  %s783_s3 = inlined_call_operand.vmem [shape: bf16[384,128], index: 3, kind: input, shape index: {}]   ;;  %s784_s1 = inlined_call_operand.vmem [shape: bf16[1,128], index: 1, kind: input, shape index: {}]   ;;  %s785_s2 = inlined_call_operand.vmem [shape: bf16[1,128], index: 2, kind: input, shape index: {}]   ;;  %s786_s0 = inlined_call_operand.vmem [shape: bf16[2,18,128], index: 0, kind: input, shape index: {}]   ;;  %s787_s4 = inlined_call_operand.vmem [shape: f32[1,128], index: 4, kind: input, shape index: {}]   ;;  %s788_s5 = inlined_call_operand.vmem [shape: bf16[2,16,128], index: 5, kind: output, shape index: {}]  }
   0x1   :  { %v594_v0 = vld [vmem:[%s783_s3 + $0x40] sm:$0xff]   ;;  %v596_v2 = vld [vmem:[%s783_s3 + $0x48] sm:$0xff]   ;;  %v599_v5 = vld [vmem:[%s783_s3 + $0x50] sm:$0xff]   ;;  %vm117_vm7 = vsmask.f32 7424 }
   0x2   :  { %v595_v1 = vld [vmem:[%s783_s3] sm:$0xff]   ;;  %534 = vmatprep.subr.bf16.mxu0 %v594_v0  ;;  %v598_v4 = vld [vmem:[%s783_s3 + $0x8] sm:$0xff]   ;;  %v601_v7 = vld [vmem:[%s783_s3 + $0x10] sm:$0xff]   ;;  %v32_v19 = vshrl.u32 %v31_v15, 7 }
   0x3   :  { %535 = vmatpush3.bf16.msra.mxu0 %v595_v1  ;;  %v597_v3 = vld [vmem:[%s783_s3 + $0x80] sm:$0xff]   ;;  %v600_v6 = vld [vmem:[%s783_s3 + $0x88] sm:$0xff]   ;;  %v602_v8 = vld [vmem:[%s783_s3 + $0x58] sm:$0xff]  }
   0x4   :  { %536 = vmatprep.subr.bf16.mxu0 %v596_v2  ;;  %572 = vmatprep.subr.bf16.mxu1 %v597_v3  ;;  %v603_v9 = vld [vmem:[%s783_s3 + $0x90] sm:$0xff]   ;;  %v604_v10 = vld [vmem:[%s783_s3 + $0x18] sm:$0xff]   ;;  %v605_v11 = vld [vmem:[%s783_s3 + $0x60] sm:$0xff]   ;;  %v33_v23 = vsub.s32 0, %v32_v19  ;;  %v72_v32 = vadd.s32 16, %v32_v19  ;;  %vm73_vm0 = vcmp.ge.s32.totalorder %v32_v19, 1 }
   0x5   :  { %573 = vmatpush3.bf16.msra.mxu1 %v597_v3  ;;  %v606_v12 = vld [vmem:[%s783_s3 + $0x98] sm:$0xff]   ;;  %v607_v13 = vld [vmem:[%s783_s3 + $0x20] sm:$0xff]   ;;  %v608_v16 = vld [vmem:[%s783_s3 + $0x68] sm:$0xff]  }
   0x6   :  { %574 = vmatprep.subr.bf16.mxu1 %v600_v6  ;;  %v609_v14 = vld [vmem:[%s783_s3 + $0xa0] sm:$0xff]   ;;  %v610_v17 = vld [vmem:[%s783_s3 + $0x28] sm:$0xff]   ;;  %v611_v20 = vld [vmem:[%s783_s3 + $0x70] sm:$0xff]   ;;  %vm78_vm1 = vcmp.le.s32.totalorder %v72_v32, 16 }
   0x7   :  { %537 = vmatpush3.bf16.msra.mxu0 %v598_v4  ;;  %v612_v18 = vld [vmem:[%s783_s3 + $0xa8] sm:$0xff]   ;;  %v613_v21 = vld [vmem:[%s783_s3 + $0x30] sm:$0xff]   ;;  %v614_v24 = vld [vmem:[%s783_s3 + $0x78] sm:$0xff]  }
   0x8   :  { %538 = vmatprep.subr.bf16.mxu0 %v599_v5  ;;  %v615_v22 = vld [vmem:[%s783_s3 + $0xb0] sm:$0xff]   ;;  %v27_v25 = vld [vmem:[%s784_s1] sm:$0x1]  ;;  %v616_v29 = vld [vmem:[%s783_s3 + $0x38] sm:$0xff]  }
   0x9   :  { %575 = vmatpush3.bf16.msra.mxu1 %v600_v6  ;;  %v45_v26 = vld [vmem:[%s785_s2] sm:$0x1]  ;;  %v29_v27 = vpack.i.b16 %v27_v25, %v27_v25  ;;  %v617_v33 = vld [vmem:[%s783_s3 + $0xb8] sm:$0xff]   ;;  %v22_v35 = vld [vmem:[%s786_s0 + $0x4] sm:$0xf] }
   0xa   :  { %576 = vmatprep.subr.bf16.mxu1 %v603_v9  ;;  %v47_v28 = vpack.i.b16 %v45_v26, %v45_v26  ;;  %v21_v34 = vld [vmem:[%s786_s0] sm:$0xf]  ;;  %v23_v36 = vld [vmem:[%s786_s0 + $0x8] sm:$0x1]  ;;  %v24_v39 = vld [vmem:[%s786_s0 + $0xc] sm:$0xf] }
   0xb   :  { %539 = vmatpush3.bf16.msra.mxu0 %v601_v7  ;;  %v34_v30 = vrot.slane %v29_v27, %v33_v23  ;;  %v25_v40 = vld [vmem:[%s786_s0 + $0x10] sm:$0xf]  ;;  %v26_v41 = vld [vmem:[%s786_s0 + $0x14] sm:$0x1]  ;;  %vm748_vm2 = vmpackc.low %vm73_vm0, %vm73_vm0 }
   0xc   :  { %540 = vmatprep.subr.bf16.mxu0 %v602_v8  ;;  %v52_v31 = vrot.slane %v47_v28, %v33_v23  ;;  %vm752_vm4 = vmpackc.low %vm618_vm3, %vm618_vm3 }
   0xd   :  { %577 = vmatpush3.bf16.msra.mxu1 %v603_v9  ;;  %v484_v37 = vcombine.low %v34_v30, %v34_v30  ;;  %vm756_vm5 = vmpackc.low %vm78_vm1, %vm78_vm1 }
   0xe   :  { %578 = vmatprep.subr.bf16.mxu1 %v606_v12  ;;  %v485_v38 = vcombine.low %v52_v31, %v52_v31 }
   0xf   :  { %541 = vmatpush3.bf16.msra.mxu0 %v604_v10  ;;  %v39_v42 = vmul.bf16 %v484_v37, %v21_v34  ;;  %v40_v43 = vmul.bf16 %v484_v37, %v22_v35  ;;  %v41_v44 = vmul.bf16 %v484_v37, %v23_v36  ;;  %v42_v46 = vmul.bf16 %v484_v37, %v24_v39  ;;  %v490_v35 = vld [vmem:[%s787_s4] ss:$0 sm:$0xff] }
  0x10   :  { %542 = vmatprep.subr.bf16.mxu0 %v605_v11  ;;  %v43_v47 = vmul.bf16 %v484_v37, %v25_v40  ;;  %v44_v48 = vmul.bf16 %v484_v37, %v26_v41 }
  0x11   :  { %579 = vmatpush3.bf16.msra.mxu1 %v606_v12  ;;  %v57_v49 = vadd.bf16 %v485_v38, %v39_v42  ;;  %v58_v50 = vadd.bf16 %v485_v38, %v40_v43  ;;  %v59_v51 = vadd.bf16 %v485_v38, %v41_v44  ;;  %v60_v54 = vadd.bf16 %v485_v38, %v42_v46 }
  0x12   :  { %580 = vmatprep.subr.bf16.mxu1 %v609_v14  ;;  %v61_v55 = vadd.bf16 %v485_v38, %v43_v47  ;;  %v62_v56 = vadd.bf16 %v485_v38, %v44_v48 }
  0x13   :  { %543 = vmatpush3.bf16.msra.mxu0 %v607_v13  ;;  %v63_v58 = vmax.bf16 %v619_v57, %v57_v49  ;;  %v64_v59 = vmax.bf16 %v619_v57, %v58_v50  ;;  %v65_v60 = vmax.bf16 %v619_v57, %v59_v51  ;;  %v66_v61 = vmax.bf16 %v619_v57, %v60_v54 }
  0x14   :  { %544 = vmatprep.subr.bf16.mxu0 %v608_v16  ;;  %v67_v62 = vmax.bf16 %v619_v57, %v61_v55  ;;  %v68_v63 = vmax.bf16 %v619_v57, %v62_v56 }
  0x15   :  { %581 = vmatpush3.bf16.msra.mxu1 %v609_v14  ;;  %v91_v0 = vsel %vm748_vm2, %v63_v58, 0  ;;  %v92_v1 = vsel %vm752_vm4, %v64_v59, 0  ;;  %v93_v2 = vsel %vm756_vm5, %v65_v60, 0  ;;  %v94_v5 = vsel %vm748_vm2, %v66_v61, 0 }
  0x16   :  { %582 = vmatprep.subr.bf16.mxu1 %v612_v18  ;;  %v486_v3 = vcombine.low %v91_v0, %v92_v1  ;;  %v488_v4 = vcombine.low %v93_v2, %v93_v2  ;;  %v95_v6 = vsel %vm752_vm4, %v67_v62, 0  ;;  %v96_v7 = vsel %vm756_vm5, %v68_v63, 0 }
  0x17   :  { %545 = vmatpush3.bf16.msra.mxu0 %v610_v17  ;;  %v487_v8 = vcombine.low %v94_v5, %v95_v6  ;;  %v489_v14 = vcombine.low %v96_v7, %v96_v7 }
  0x18   :  { %546 = vmatprep.subr.bf16.mxu0 %v611_v20  ;;  %v119_v9 = vshrl.u32 %v486_v3, 16  ;;  %v121_v10 = vshll.u32 %v486_v3, 16  ;;  %v126_v11 = vshll.u32 %v488_v4, 16  ;;  %v147_v12 = vrot.slane %v486_v3, 1 }
  0x19   :  { %583 = vmatpush3.bf16.msra.mxu1 %v612_v18  ;;  %v148_v13 = vrot.slane %v488_v4, 1  ;;  %v150_v15 = vrot.slane %v487_v8, 1  ;;  %v131_v18 = vshrl.u32 %v487_v8, 16  ;;  %v133_v19 = vshll.u32 %v487_v8, 16 }
  0x1a   :  { %584 = vmatprep.subr.bf16.mxu1 %v615_v22  ;;  %v123_v16 = vrot.slane %v121_v10, 1  ;;  %v128_v17 = vrot.slane %v126_v11, 1 }
  0x1b   :  { %547 = vmatpush3.bf16.msra.mxu0 %v613_v21  ;;  %v149_v20 = vsel %vm146_vm6, %v147_v12, %v148_v13  ;;  %v151_v21 = vrot.slane %v489_v14, 1 }
  0x1c   :  { %548 = vmatprep.subr.bf16.mxu0 %v614_v24  ;;  %v124_v23 = vor.u32 %v123_v16, %v119_v9  ;;  %588 = vmatprep.mubr.bf16.mxu1 %v149_v20  ;;  %v135_v24 = vrot.slane %v133_v19, 1 }
  0x1d   :  { %585 = vmatpush3.bf16.msra.mxu1 %v615_v22  ;;  %v138_v22 = vshll.u32 %v489_v14, 16  ;;  %v152_v25 = vsel %vm146_vm6, %v150_v15, %v151_v21 }
  0x1e   :  { %586 = vmatprep.subr.bf16.mxu1 %v617_v33  ;;  %v129_v27 = vsel %vm117_vm7, %v124_v23, %v128_v17  ;;  %v136_v28 = vor.u32 %v135_v24, %v131_v18 }
  0x1f   :  { %549 = vmatpush3.bf16.msra.mxu0 %v616_v29  ;;  %v140_v26 = vrot.slane %v138_v22, 1  ;;  %394 = vmatprep.mubr.bf16.mxu0 %v129_v27 }
  0x21   :  { %587 = vmatpush3.bf16.msra.mxu1 %v617_v33  ;;  %v141_v29 = vsel %vm117_vm7, %v136_v28, %v140_v26 }
  0x22   :  { %395 = vmatmul.mubr.bf16.vlgmr.msra.gmra.mrb[0].mxu0 %v486_v3 }
  0x23   :  { %402 = vmatprep.mubr.bf16.mxu0 %v141_v29 }
  0x24   :  { %589 = vmatmul.mubr.bf16.vlgmr.msra.gmra.mrb[0].mxu1 %v152_v25 }
  0x2a   :  { %403 = vmatmul.mubr.bf16.gmra.mrb[4].mxu0 %v487_v8 }
  0xf5   :  { %v550_v32 = vpop.f32.mrb[0].mxu0 }
  0xf6   :  { %v551_v34 = vpop.f32.mrb[1].mxu0 }
  0xf7   :  { %v590_v30 = vpop.f32.mrb[0].mxu1  ;;  %v552_v37 = vadd.f32 %v551_v34, %v550_v32  ;;  %v553_v38 = vpop.f32.mrb[2].mxu0 }
  0xf8   :  { %v445_v31 = vpop.f32.mrb[1].mxu1  ;;  %v554_v39 = vpop.f32.mrb[3].mxu0 }
  0xf9   :  { %v591_v33 = vpop.f32.mrb[2].mxu1  ;;  %v555_v40 = vadd.f32 %v554_v39, %v553_v38  ;;  %v397_v41 = vadd.f32 %v552_v37, %v490_v35 }
  0xfa   :  { %v448_v36 = vpop.f32.mrb[3].mxu1 }
  0xfb   :  { %v446_v42 = vadd.f32 %v445_v31, %v397_v41  ;;  %v400_v43 = vadd.f32 %v555_v40, %v490_v35 }
  0xfd   :  { %v449_v44 = vadd.f32 %v448_v36, %v400_v43  ;;  %v556_v45 = vpop.f32.mrb[4].mxu0 }
  0xfe   :  { %v557_v46 = vpop.f32.mrb[5].mxu0 }
  0xff   :  { %v526_v47 = vpack.c.bf16 %v449_v44, %v446_v42  ;;  %v558_v48 = vadd.f32 %v557_v46, %v556_v45  ;;  %v559_v49 = vpop.f32.mrb[6].mxu0 }
 0x100   :  { %v560_v50 = vpop.f32.mrb[7].mxu0 }
 0x101   :  { %527 = vst [vmem:[%s788_s5] sm:$0xff] %v526_v47   ;;  %v405_v51 = vadd.f32 %v558_v48, %v490_v35  ;;  %v561_v52 = vadd.f32 %v560_v50, %v559_v49 }
 0x103   :  { %v454_v53 = vadd.f32 %v590_v30, %v405_v51  ;;  %v408_v54 = vadd.f32 %v561_v52, %v490_v35 }
 0x105   :  { %v457_v55 = vadd.f32 %v591_v33, %v408_v54 }
 0x107   :  { %v531_v56 = vpack.c.bf16 %v457_v55, %v454_v53 }
 0x109   :  { %533 = vst [vmem:[%s788_s5 + $0x8] sm:$0xff] %v531_v56  }

</bundles_post_ra>
